<compile_context>
chip_gen: v7x
topology: tpu7x:2x2x1
jax: 0.10.0
libtpu: 0.0.40
codegen_flags: <defaults>
</compile_context>

<pallas_src>
import functools
import math

import numpy as np

import jax
import jax.numpy as jnp
from jax.experimental import pallas as pl
from jax.experimental.pallas import tpu as pltpu


# ----------------------------------------------------------------------------
# Filter construction (host-side, cached per (N, P, Npad)).
# ----------------------------------------------------------------------------
def _ramp_impulse_np(size: int) -> np.ndarray:
    """Real-space ramp impulse response f (the `f` the reference rfft's)."""
    n = np.concatenate(
        [
            np.arange(1, size // 2 + 1, 2, dtype=np.float64),
            np.arange(size // 2 - 1, 0, -2, dtype=np.float64),
        ]
    )
    f = np.zeros(size, dtype=np.float64)
    f[0] = 0.25
    f[1::2] = -1.0 / (np.pi * n) ** 2
    return f


@functools.lru_cache(maxsize=None)
def _build_filter_matrix(input_size: int, padded_size: int, n_pad: int):
    """Circulant matrix M[n, m] = h[(n - m) mod P] with h = 2*f (RampFilter,
    create_filter == identity), zero-padded to [n_pad, n_pad].  Extra rows /
    cols are zero, so padding is exact after truncation.  Returned in bf16
    (native MXU rate); accumulation is done in f32 inside the kernel."""
    h = 2.0 * _ramp_impulse_np(padded_size)
    idx = (
        np.arange(input_size)[:, None] - np.arange(input_size)[None, :]
    ) % padded_size
    m = np.zeros((n_pad, n_pad), dtype=np.float32)
    m[:input_size, :input_size] = h[idx]
    return jnp.asarray(m, dtype=jnp.bfloat16)


def _round_up(x: int, m: int) -> int:
    return (x + m - 1) // m * m


def _pick_tile(size: int, candidates) -> int:
    """Largest candidate that evenly divides `size` (size is a multiple of 128)."""
    for c in candidates:
        if size % c == 0:
            return c
    return size


# ----------------------------------------------------------------------------
# Pallas kernel: one output tile per grid step, full contraction per block.
# ----------------------------------------------------------------------------
def _dot_kernel(a_ref, b_ref, o_ref):
    # a_ref: [TM, K] bf16, b_ref: [K, TN] bf16, o_ref: [TM, TN] out dtype.
    o_ref[...] = jnp.dot(
        a_ref[...], b_ref[...], preferred_element_type=jnp.float32
    ).astype(o_ref.dtype)


def _pallas_matmul(a, b, out_dtype):
    """out = a @ b with the whole contraction inside each block.
    a: [M, K], b: [K, N]; M, K, N are all multiples of 128 (bf16 inputs)."""
    m_dim, k_dim = a.shape
    _, n_dim = b.shape

    tm = _pick_tile(m_dim, (512, 256, 128))
    tn = _pick_tile(n_dim, (1024, 512, 256, 128))
    grid = (m_dim // tm, n_dim // tn)

    # Grid-invariant operands don't need double buffering (saves VMEM,
    # notably for the resident filter matrix).
    a_kwargs = {"pipeline_mode": pl.Buffered(1)} if grid[0] == 1 else {}
    b_kwargs = {"pipeline_mode": pl.Buffered(1)} if grid[1] == 1 else {}

    out_itemsize = jnp.dtype(out_dtype).itemsize
    a_bytes = tm * k_dim * a.dtype.itemsize * (1 if grid[0] == 1 else 2)
    b_bytes = k_dim * tn * b.dtype.itemsize * (1 if grid[1] == 1 else 2)
    o_bytes = tm * tn * out_itemsize * 2
    vmem_limit = int(
        min(64 * 2**20, max(32 * 2**20, 2 * (a_bytes + b_bytes + o_bytes)))
    )

    cost = pl.CostEstimate(
        flops=2 * m_dim * k_dim * n_dim,
        transcendentals=0,
        bytes_accessed=(
            a.size * a.dtype.itemsize
            + b.size * b.dtype.itemsize
            + m_dim * n_dim * out_itemsize
        ),
    )

    return pl.pallas_call(
        _dot_kernel,
        out_shape=jax.ShapeDtypeStruct((m_dim, n_dim), out_dtype),
        grid_spec=pltpu.PrefetchScalarGridSpec(
            num_scalar_prefetch=0,
            grid=grid,
            in_specs=[
                pl.BlockSpec((tm, k_dim), lambda i, j: (i, 0), **a_kwargs),
                pl.BlockSpec((k_dim, tn), lambda i, j: (0, j), **b_kwargs),
            ],
            out_specs=pl.BlockSpec((tm, tn), lambda i, j: (i, j)),
        ),
        compiler_params=pltpu.CompilerParams(
            dimension_semantics=("parallel", "parallel"),
            vmem_limit_bytes=vmem_limit,
        ),
        cost_estimate=cost,
    )(a, b)


# ----------------------------------------------------------------------------
# Forward wrapper (AbstractFilter.forward, RampFilter variant, 4-D input).
# ----------------------------------------------------------------------------
def ramp_filter_forward(x: jnp.ndarray, dim: int = -2) -> jnp.ndarray:
    assert x.ndim == 4, "expected a 4-D sinogram"
    # TODO(synk): the 5-D ([B,C,H,A,N]) branch of forward is not implemented.

    n = x.shape[dim]
    padded_size = max(64, int(2 ** math.ceil(math.log2(2 * n))))
    n_pad = _round_up(n, 128)
    m_mat = _build_filter_matrix(n, padded_size, n_pad)  # [n_pad, n_pad] bf16

    if dim in (-2, 2):
        # Default [B,C,N,A] convention: Y = M @ X with X = [N, B*C*A]
        # (lane-dense output columns, one big matmul for all slices).
        b, c, _, a = x.shape
        cols = b * c * a
        cols_pad = _round_up(cols, 128)
        xm = jnp.moveaxis(x, 2, 0).reshape(n, cols)
        xm = jnp.pad(xm, ((0, n_pad - n), (0, cols_pad - cols))).astype(jnp.bfloat16)
        y = _pallas_matmul(m_mat, xm, x.dtype)[:n, :cols]
        return jnp.moveaxis(y.reshape(n, b, c, a), 0, 2)

    if dim in (-1, 3):
        # astra [B,C,A,N] convention: filter along the last axis.  M is
        # symmetric, so right-multiplication yields a lane-dense output in the
        # native layout without any wrapper transposes.
        b, c, a, _ = x.shape
        rows = b * c * a
        rows_pad = _round_up(rows, 128)
        xm = x.reshape(rows, n)
        xm = jnp.pad(xm, ((0, rows_pad - rows), (0, n_pad - n))).astype(jnp.bfloat16)
        y = _pallas_matmul(xm, m_mat, x.dtype)[:rows, :n]
        return y.reshape(b, c, a, n)

    raise ValueError(f"unsupported dim={dim}")


# ----------------------------------------------------------------------------
# Pure-JAX FFT reference reproducing the PyTorch forward exactly.
# ----------------------------------------------------------------------------
def _fft_reference(x: jnp.ndarray, dim: int) -> jnp.ndarray:
    n = x.shape[dim]
    padded = max(64, int(2 ** math.ceil(math.log2(2 * n))))
    f = jnp.asarray(_ramp_impulse_np(padded), dtype=jnp.float32)
    fourier_filter = 2.0 * jnp.fft.rfft(f)  # create_filter == identity
    pad = [(0, 0)] * x.ndim
    pad[dim] = (0, padded - n)
    x_pad = jnp.pad(x, pad)
    shape = [1] * x.ndim
    shape[dim] = fourier_filter.shape[0]
    proj = jnp.fft.rfft(x_pad, axis=dim) * fourier_filter.reshape(shape)
    res = jnp.fft.irfft(proj, axis=dim)
    ax = dim % x.ndim
    sl = [slice(None)] * x.ndim
    sl[ax] = slice(0, n)
    return res[tuple(sl)]


# ----------------------------------------------------------------------------
# Demo + correctness checks.
# ----------------------------------------------------------------------------
if __name__ == "__main__":
    k1, k2 = jax.random.split(jax.random.PRNGKey(0))

    # [B, C, N, A] default convention, dim=-2.
    B, C, N, A = 2, 4, 16, 16
    x = jax.random.normal(k1, (B, C, N, A), dtype=jnp.float32)
    y = ramp_filter_forward(x, dim=-2)
    jax.block_until_ready(y)
    ref = _fft_reference(x, -2)
    err = float(jnp.max(jnp.abs(y - ref)))
    assert err < 5e-2, f"dim=-2 mismatch vs FFT reference: max abs err {err}"

    # astra convention [B, C, A, N], dim=-1 (right-multiply path).
    xa = jnp.swapaxes(x, -1, -2)
    ya = ramp_filter_forward(xa, dim=-1)
    jax.block_until_ready(ya)
    err_a = float(jnp.max(jnp.abs(ya - jnp.swapaxes(ref, -1, -2))))
    assert err_a < 5e-2, f"dim=-1 mismatch vs FFT reference: max abs err {err_a}"

    # Ragged shape (exercises zero-padding to 128 multiples + multi-tile grid).
    x2 = jax.random.normal(k2, (2, 2, 40, 50), dtype=jnp.float32)
    y2 = ramp_filter_forward(x2, dim=-2)
    jax.block_until_ready(y2)
    err2 = float(jnp.max(jnp.abs(y2 - _fft_reference(x2, -2))))
    assert err2 < 5e-2, f"ragged dim=-2 mismatch vs FFT reference: max abs err {err2}"

    print("KERNEL_OK")
</pallas_src>

<mosaic_0001>
module attributes {stable_mosaic.version = 11 : i64} {
  func.func @_dot_kernel(%arg0: i32, %arg1: i32, %arg2: memref<128x128xbf16, #tpu.memory_space<vmem>>, %arg3: memref<128x128xbf16, #tpu.memory_space<vmem>>, %arg4: memref<128x128xf32, #tpu.memory_space<vmem>>) attributes {dimension_semantics = [#tpu.dimension_semantics<parallel>, #tpu.dimension_semantics<parallel>], iteration_bounds = array<i64: 1, 1>, scalar_prefetch = 0 : i64, scratch_operands = 0 : i64, tpu.core_type = #tpu.core_type<tc>, window_params = [{pipeline_mode = #tpu.pipeline_mode<synchronous>, transform_indices = @transform_0, window_bounds = array<i64: 128, 128>}, {pipeline_mode = #tpu.pipeline_mode<synchronous>, transform_indices = @transform_1, window_bounds = array<i64: 128, 128>}, {transform_indices = @transform_2, window_bounds = array<i64: 128, 128>}]} {
    %c0 = arith.constant 0 : index
    %c0_0 = arith.constant 0 : index
    %0 = vector.load %arg2[%c0, %c0_0] : memref<128x128xbf16, #tpu.memory_space<vmem>>, vector<128x128xbf16>
    %c0_1 = arith.constant 0 : index
    %c0_2 = arith.constant 0 : index
    %1 = vector.load %arg3[%c0_1, %c0_2] : memref<128x128xbf16, #tpu.memory_space<vmem>>, vector<128x128xbf16>
    %cst = arith.constant dense<0.000000e+00> : vector<128x128xf32>
    %2 = tpu.matmul %0, %1, %cst {dimension_numbers = #tpu.dot_dimension_numbers<[1], [0], [0], [1], [0, 0, 1, 1], [], []>} : vector<128x128xbf16>, vector<128x128xbf16>, vector<128x128xf32> -> vector<128x128xf32>
    %c0_3 = arith.constant 0 : index
    %c0_4 = arith.constant 0 : index
    %3 = vector.load %arg4[%c0_3, %c0_4] : memref<128x128xf32, #tpu.memory_space<vmem>>, vector<128x128xf32>
    tpu.vector_store %arg4[%c0_3, %c0_4], %2 {strides = array<i32>} : memref<128x128xf32, #tpu.memory_space<vmem>>, vector<128x128xf32>,
    return
  }
  func.func @transform_0(%arg0: i32, %arg1: i32) -> (i32, i32) {
    %c0_i32 = arith.constant 0 : i32
    %c0_i32_0 = arith.constant 0 : i32
    return %arg0, %c0_i32 : i32, i32
  }
  func.func @transform_1(%arg0: i32, %arg1: i32) -> (i32, i32) {
    %c0_i32 = arith.constant 0 : i32
    %c0_i32_0 = arith.constant 0 : i32
    return %c0_i32, %arg1 : i32, i32
  }
  func.func @transform_2(%arg0: i32, %arg1: i32) -> (i32, i32) {
    %c0_i32 = arith.constant 0 : i32
    return %arg0, %arg1 : i32, i32
  }
}

</mosaic_0001>

<bundles_post_ra>
// kernel: tpu_custom_call.1
= control target key start
LH: loop header
LB: loop body
LE: loop exit
PB: predicated region body
PF: predicated region fallthrough
CT: control target
= control target key end

     0   :  { %7 = vsyncpa [#allocation3], 0  ;;  %s533_s0 = inlined_call_operand.hbm [shape: bf16[128,128], index: 0, kind: input, shape index: {}]   ;;  %s534_s1 = inlined_call_operand.hbm [shape: bf16[128,128], index: 1, kind: input, shape index: {}]   ;;  %s535_s2 = inlined_call_operand.hbm [shape: f32[128,128], index: 2, kind: output, shape index: {}]  }
   0x1   :  { %8 = vsyncpa [#allocation6], 0 }
   0x2   :  { %9 = vsyncpa [#allocation4], 0  ;;  %s475_s9 = smov [#allocation2]   ;;  %s403_s13 = scalar_lea.hbm %s533_s0, 1024 }
   0x3   :  { %s15_s10 = sshll.u32 %s475_s9, 4  ;;  %p404_p0 = scmp.ne.s32.totalorder %s533_s0, %s403_s13  ;;  %s16_s10 = int_to_ptr.vmem [resolvable:$true] %s15_s10 }
   0x4   :  { %p407_p1 = scmp.lt.u32.totalorder %s403_s13, %s533_s0 }
   0x6   :  { %p409_p2 = pnand %p407_p1, %p404_p0 }
   0x8   :  { %412 = shalt.err (!%p409_p2)
}
   0x9   :  { %s413_s18 = scalar_lea.vmem %s16_s10, 1024  ;;  %p418_p4 = scmp.lt.s32.totalorder %s16_s10, %s16_s10 }
   0xa   :  { %p414_p3 = scmp.ne.s32.totalorder %s16_s10, %s413_s18  ;;  %p419_p5 = scmp.lt.s32.totalorder %s413_s18, %s413_s18 }
   0xc   :  { %p420_p6 = por %p419_p5, %p418_p4 }
   0xe   :  { %p421_p7 = pnand %p420_p6, %p414_p3 }
  0x10   :  { %424 = shalt.err (!%p421_p7)
}
  0x11   :  { %s476_s19 = smov 64   ;;  %s477_s20 = smov 4  }
  0x12   :  { %21 = dma.hbm_to_vmem [thread:$0]  %s533_s0, 1024, %s16_s10, [#allocation3], %s476_s19, %s476_s19, %s477_s20  }
  0x13   :  { %s478_s23 = smov [#allocation5]   ;;  %s425_s27 = scalar_lea.hbm %s534_s1, 1024 }
  0x14   :  { %s27_s24 = sshll.u32 %s478_s23, 4  ;;  %p426_p8 = scmp.ne.s32.totalorder %s534_s1, %s425_s27  ;;  %s28_s24 = int_to_ptr.vmem [resolvable:$true] %s27_s24 }
  0x15   :  { %p429_p9 = scmp.lt.u32.totalorder %s425_s27, %s534_s1 }
  0x17   :  { %p431_p10 = pnand %p429_p9, %p426_p8 }
  0x19   :  { %434 = shalt.err (!%p431_p10)
}
  0x1a   :  { %s435_s4 = scalar_lea.vmem %s28_s24, 1024  ;;  %p440_p12 = scmp.lt.s32.totalorder %s28_s24, %s28_s24 }
  0x1b   :  { %p436_p11 = scmp.ne.s32.totalorder %s28_s24, %s435_s4  ;;  %p441_p13 = scmp.lt.s32.totalorder %s435_s4, %s435_s4 }
  0x1d   :  { %p442_p0 = por %p441_p13, %p440_p12 }
  0x1f   :  { %p443_p1 = pnand %p442_p0, %p436_p11 }
  0x21   :  { %446 = shalt.err (!%p443_p1)
}
  0x22   :  { %33 = dma.hbm_to_vmem [thread:$0]  %s534_s1, 1024, %s28_s24, [#allocation6], %s476_s19, %s476_s19, %s477_s20  }
  0x23   :  { %469 = dma.done.wait [#allocation3], 1024  }
  0x24   :  { %470 = vsyncadd [#allocation3], 4294966272 }
  0x25   :  { %471 = dma.done.wait [#allocation6], 1024  }
  0x26   :  { %472 = vsyncadd [#allocation6], 4294966272  ;;  %v387_v0 = vld [vmem:[#allocation5] sm:$0xff]   ;;  %v388_v1 = vld [vmem:[#allocation5 + $0x8] sm:$0xff]   ;;  %s479_s1 = smov [#allocation7]  }
  0x27   :  { %332 = vmatprep.subr.bf16.mxu0 %v387_v0  ;;  %364 = vmatprep.subr.bf16.mxu1 %v387_v0  ;;  %v389_v2 = vld [vmem:[#allocation5 + $0x10] sm:$0xff]   ;;  %v390_v3 = vld [vmem:[#allocation5 + $0x18] sm:$0xff]   ;;  %v395_v4 = vld [vmem:[#allocation2] sm:$0xff]   ;;  %s287_s6 = sshll.u32 %s479_s1, 4  ;;  %s288_s6 = int_to_ptr.vmem [resolvable:$true] %s287_s6 }
  0x28   :  { %333 = vmatpush3.bf16.msra.mxu0 %v387_v0  ;;  %372 = vmatpush3.bf16.msra.mxu1 %v387_v0  ;;  %v396_v5 = vld [vmem:[#allocation2 + $0x20] sm:$0xff]   ;;  %v392_v7 = vld [vmem:[#allocation5 + $0x28] sm:$0xff]   ;;  %v393_v8 = vld [vmem:[#allocation5 + $0x30] sm:$0xff]   ;;  %s447_s7 = scalar_lea.vmem %s288_s6, 2048  ;;  %p452_p3 = scmp.lt.s32.totalorder %s288_s6, %s288_s6 }
  0x29   :  { %334 = vmatprep.subr.bf16.mxu0 %v388_v1  ;;  %365 = vmatprep.subr.bf16.mxu1 %v388_v1  ;;  %v391_v6 = vld [vmem:[#allocation5 + $0x20] sm:$0xff]   ;;  %v394_v9 = vld [vmem:[#allocation5 + $0x38] sm:$0xff]   ;;  %v397_v10 = vld [vmem:[#allocation2 + $0x8] sm:$0xff]   ;;  %p448_p2 = scmp.ne.s32.totalorder %s288_s6, %s447_s7  ;;  %p453_p4 = scmp.lt.s32.totalorder %s447_s7, %s447_s7 }
  0x2a   :  { %348 = vmatprep.mubr.bf16.mxu0 %v395_v4  ;;  %356 = vmatprep.mubr.bf16.mxu1 %v396_v5  ;;  %v398_v11 = vld [vmem:[#allocation2 + $0x28] sm:$0xff]   ;;  %v399_v12 = vld [vmem:[#allocation2 + $0x10] sm:$0xff]   ;;  %v401_v14 = vld [vmem:[#allocation2 + $0x18] sm:$0xff]  }
  0x2b   :  { %v400_v13 = vld [vmem:[#allocation2 + $0x30] sm:$0xff]   ;;  %v402_v15 = vld [vmem:[#allocation2 + $0x38] sm:$0xff]   ;;  %p454_p5 = por %p453_p4, %p452_p3 }
  0x2c   :  { %335 = vmatpush3.bf16.msra.mxu0 %v388_v1  ;;  %373 = vmatpush3.bf16.msra.mxu1 %v388_v1 }
  0x2d   :  { %336 = vmatprep.subr.bf16.mxu0 %v389_v2  ;;  %366 = vmatprep.subr.bf16.mxu1 %v389_v2  ;;  %p455_p6 = pnand %p454_p5, %p448_p2 }
  0x30   :  { %337 = vmatpush3.bf16.msra.mxu0 %v389_v2  ;;  %374 = vmatpush3.bf16.msra.mxu1 %v389_v2 }
  0x31   :  { %338 = vmatprep.subr.bf16.mxu0 %v390_v3  ;;  %367 = vmatprep.subr.bf16.mxu1 %v390_v3 }
  0x34   :  { %339 = vmatpush3.bf16.msra.mxu0 %v390_v3  ;;  %375 = vmatpush3.bf16.msra.mxu1 %v390_v3 }
  0x35   :  { %340 = vmatprep.subr.bf16.mxu0 %v391_v6  ;;  %368 = vmatprep.subr.bf16.mxu1 %v391_v6 }
  0x38   :  { %341 = vmatpush3.bf16.msra.mxu0 %v391_v6  ;;  %376 = vmatpush3.bf16.msra.mxu1 %v391_v6 }
  0x39   :  { %342 = vmatprep.subr.bf16.mxu0 %v392_v7  ;;  %369 = vmatprep.subr.bf16.mxu1 %v392_v7 }
  0x3c   :  { %343 = vmatpush3.bf16.msra.mxu0 %v392_v7  ;;  %377 = vmatpush3.bf16.msra.mxu1 %v392_v7 }
  0x3d   :  { %344 = vmatprep.subr.bf16.mxu0 %v393_v8  ;;  %370 = vmatprep.subr.bf16.mxu1 %v393_v8 }
  0x40   :  { %345 = vmatpush3.bf16.msra.mxu0 %v393_v8  ;;  %378 = vmatpush3.bf16.msra.mxu1 %v393_v8 }
  0x41   :  { %346 = vmatprep.subr.bf16.mxu0 %v394_v9  ;;  %371 = vmatprep.subr.bf16.mxu1 %v394_v9 }
  0x44   :  { %347 = vmatpush3.bf16.msra.mxu0 %v394_v9  ;;  %379 = vmatpush3.bf16.msra.mxu1 %v394_v9 }
  0x47   :  { %349 = vmatmul.mubr.bf16.vlgmr.msra.gmra.mrb[0].mxu0 %v397_v10  ;;  %357 = vmatmul.mubr.bf16.vlgmr.msra.gmra.mrb[0].mxu1 %v398_v11 }
  0x48   :  { %352 = vmatprep.mubr.bf16.mxu0 %v399_v12  ;;  %360 = vmatprep.mubr.bf16.mxu1 %v400_v13 }
  0x4f   :  { %353 = vmatmul.mubr.bf16.gmra.mrb[4].mxu0 %v401_v14  ;;  %361 = vmatmul.mubr.bf16.gmra.mrb[4].mxu1 %v402_v15 }
 0x11a   :  { %v350_v16 = vpop.f32.mrb[0].mxu0  ;;  %v358_v17 = vpop.f32.mrb[0].mxu1 }
 0x11b   :  { %268 = vst [vmem:[#allocation7 + $0x10] sm:$0xff] %v350_v16  ;;  %276 = vst [vmem:[#allocation7 + $0x50] sm:$0xff] %v358_v17  ;;  %v203_v18 = vpop.f32.mrb[1].mxu0  ;;  %v235_v19 = vpop.f32.mrb[1].mxu1 }
 0x11c   :  { %266 = vst [vmem:[#allocation7] sm:$0xff] %v203_v18  ;;  %274 = vst [vmem:[#allocation7 + $0x40] sm:$0xff] %v235_v19  ;;  %v351_v20 = vpop.f32.mrb[2].mxu0  ;;  %v359_v21 = vpop.f32.mrb[2].mxu1 }
 0x11d   :  { %269 = vst [vmem:[#allocation7 + $0x18] sm:$0xff] %v351_v20  ;;  %277 = vst [vmem:[#allocation7 + $0x58] sm:$0xff] %v359_v21  ;;  %v206_v22 = vpop.f32.mrb[3].mxu0  ;;  %v238_v23 = vpop.f32.mrb[3].mxu1 }
 0x11e   :  { %267 = vst [vmem:[#allocation7 + $0x8] sm:$0xff] %v206_v22  ;;  %275 = vst [vmem:[#allocation7 + $0x48] sm:$0xff] %v238_v23 }
 0x122   :  { %v354_v24 = vpop.f32.mrb[4].mxu0  ;;  %v362_v25 = vpop.f32.mrb[4].mxu1 }
 0x123   :  { %272 = vst [vmem:[#allocation7 + $0x30] sm:$0xff] %v354_v24  ;;  %280 = vst [vmem:[#allocation7 + $0x70] sm:$0xff] %v362_v25  ;;  %v219_v26 = vpop.f32.mrb[5].mxu0  ;;  %v251_v27 = vpop.f32.mrb[5].mxu1 }
 0x124   :  { %270 = vst [vmem:[#allocation7 + $0x20] sm:$0xff] %v219_v26  ;;  %278 = vst [vmem:[#allocation7 + $0x60] sm:$0xff] %v251_v27  ;;  %v355_v28 = vpop.f32.mrb[6].mxu0  ;;  %v363_v29 = vpop.f32.mrb[6].mxu1 }
 0x125   :  { %273 = vst [vmem:[#allocation7 + $0x38] sm:$0xff] %v355_v28  ;;  %281 = vst [vmem:[#allocation7 + $0x78] sm:$0xff] %v363_v29  ;;  %v222_v30 = vpop.f32.mrb[7].mxu0  ;;  %v254_v31 = vpop.f32.mrb[7].mxu1 }
 0x126   :  { %271 = vst [vmem:[#allocation7 + $0x28] sm:$0xff] %v222_v30  ;;  %279 = vst [vmem:[#allocation7 + $0x68] sm:$0xff] %v254_v31 }
 0x127   :  { %458 = shalt.err (!%p455_p6)
}
 0x128   :  { %s459_s10 = scalar_lea.hbm %s535_s2, 2048 }
 0x129   :  { %p460_p7 = scmp.ne.s32.totalorder %s535_s2, %s459_s10  ;;  %p463_p8 = scmp.lt.u32.totalorder %s459_s10, %s535_s2 }
 0x12b   :  { %p465_p9 = pnand %p463_p8, %p460_p7 }
 0x12d   :  { %468 = shalt.err (!%p465_p9)
}
 0x12e   :  { %s480_s15 = smov 128   ;;  %s481_s16 = smov 8  }
 0x12f   :  { %293 = dma.vmem_to_hbm [thread:$0]  %s288_s6, 2048, %s535_s2, [#allocation4], %s480_s15, %s480_s15, %s481_s16  }
 0x130   :  { %473 = dma.done.wait [#allocation4], 2048  }
 0x131   :  { %474 = vsyncadd [#allocation4], 4294965248 }
 0x132   :  { %297 = vsyncpa [#allocation3], 1 }
 0x133   :  { %298 = vsyncpa [#allocation6], 1 }
 0x134   :  { %299 = vsyncpa [#allocation4], 1 }

</bundles_post_ra>
